<compile_context>
chip_gen: v7x
topology: tpu7x:2x2x1
jax: 0.10.0
libtpu: 0.0.40
codegen_flags: <defaults>
</compile_context>

<pallas_src>
import jax
import jax.numpy as jnp
from jax.experimental import pallas as pl
from jax.experimental.pallas import tpu as pltpu


# ---------------------------------------------------------------------------
# Fused kernel: input projection + LSTM recurrence + decoder, single invocation.
# All operands are whole-array VMEM blocks (total footprint is a few KB).
# ---------------------------------------------------------------------------
def fused_lstm_decode_kernel(x_ref, wih_ref, whh_ref, b_ref, wlin_ref, blin_ref,
                             h0_ref, c0_ref, out_ref, hlast_ref, clast_ref, cs_scr):
    B, T, H = cs_scr.shape

    w_hh = whh_ref[...]            # (H, 4H) — reused every step
    w_lin = wlin_ref[...]          # (H, O)
    b_lin = blin_ref[...]          # (1, O)

    # Hoisted input projection: ONE time-major matmul (off the serial critical path).
    # x_ref is (T*B, I) time-major; row t*B + b corresponds to x[b, t, :].
    gx_all = (jnp.dot(x_ref[...], wih_ref[...], preferred_element_type=jnp.float32)
              + b_ref[...])        # (T*B, 4H)

    h = h0_ref[...]                # (B, H)
    c = c0_ref[...]                # (B, H)
    for t in range(T):             # static unroll; T known at trace time
        gates = (gx_all[t * B:(t + 1) * B, :]
                 + jnp.dot(h, w_hh, preferred_element_type=jnp.float32))   # (B, 4H)
        # Fused nonlinearities: one sigmoid + one tanh over the full gate vector,
        # then lane slices (instead of 4 narrow transcendental ops).
        sig = jax.nn.sigmoid(gates)
        tnh = jnp.tanh(gates)
        i_g = sig[:, 0:H]
        f_g = sig[:, H:2 * H]
        g_g = tnh[:, 2 * H:3 * H]
        o_g = sig[:, 3 * H:4 * H]
        c = f_g * c + i_g * g_g
        h = o_g * jnp.tanh(c)
        # Model.forward appends `hidden` (== cell state) each step -> VMEM scratch.
        cs_scr[:, t:t + 1, :] = c[:, None, :]

    # Fused decoder (off the serial chain): (T, H) @ (H, O) per batch element, written
    # batch-first directly. Per-batch form avoids in-kernel reshapes of the scratch.
    for b in range(B):
        out_ref[b] = (jnp.dot(cs_scr[b], w_lin, preferred_element_type=jnp.float32)
                      + b_lin)

    hlast_ref[...] = h
    clast_ref[...] = c


# ---------------------------------------------------------------------------
# Model forward (wrapper — single kernel call; only a tiny time-major relayout of x)
# ---------------------------------------------------------------------------
def model_forward(params, data, hidden):
    """data: (B, T, I) batch_first; hidden = (h, c) each (B, H)."""
    h0, c0 = hidden
    B, T, I = data.shape
    H = params["w_hh_T"].shape[0]
    O = params["w_lin_T"].shape[1]

    # Tiny XLA relayout so the kernel can do the full input projection as ONE matmul
    # and fetch per-step gate contributions as contiguous slices.
    x_tm = jnp.transpose(data, (1, 0, 2)).reshape(T * B, I)

    vmem = pl.BlockSpec(memory_space=pltpu.MemorySpace.VMEM)
    decoded, h_last, c_last = pl.pallas_call(
        fused_lstm_decode_kernel,
        out_shape=(jax.ShapeDtypeStruct((B, T, O), jnp.float32),
                   jax.ShapeDtypeStruct((B, H), jnp.float32),
                   jax.ShapeDtypeStruct((B, H), jnp.float32)),
        in_specs=[vmem] * 8,
        out_specs=(vmem, vmem, vmem),
        scratch_shapes=[pltpu.VMEM((B, T, H), jnp.float32)],
    )(x_tm, params["w_ih_T"], params["w_hh_T"], params["b_lstm"],
      params["w_lin_T"], params["b_lin"], h0, c0)

    return decoded, (h_last, c_last)


# ---------------------------------------------------------------------------
# Pure-JAX reference (for correctness check)
# ---------------------------------------------------------------------------
def ref_forward(w_ih, w_hh, b_ih, b_hh, w_lin, b_lin, data, hidden):
    H = w_hh.shape[1]
    h0, c0 = hidden
    x_tbi = jnp.transpose(data, (1, 0, 2))

    def step(carry, x_t):
        h, c = carry
        gates = x_t @ w_ih.T + b_ih + h @ w_hh.T + b_hh
        i = jax.nn.sigmoid(gates[:, :H])
        f = jax.nn.sigmoid(gates[:, H:2 * H])
        g = jnp.tanh(gates[:, 2 * H:3 * H])
        o = jax.nn.sigmoid(gates[:, 3 * H:4 * H])
        c_new = f * c + i * g
        h_new = o * jnp.tanh(c_new)
        return (h_new, c_new), c_new

    (h_f, c_f), cs = jax.lax.scan(step, (h0, c0), x_tbi)
    output = jnp.transpose(cs, (1, 0, 2))
    B, T, _ = output.shape
    decoded = output.reshape(B * T, H) @ w_lin.T + b_lin
    return decoded.reshape(B, T, -1), (h_f, c_f)


if __name__ == "__main__":
    B, T, I, H, O = 2, 8, 16, 32, 10
    forget_bias = 1.0

    key = jax.random.PRNGKey(0)
    ks = jax.random.split(key, 7)
    k_lstm = 1.0 / (H ** 0.5)
    k_lin = 1.0 / (H ** 0.5)

    # nn.LSTMCell parameters (uniform(-1/sqrt(H), 1/sqrt(H))), then forget-bias fill.
    w_ih = jax.random.uniform(ks[0], (4 * H, I), minval=-k_lstm, maxval=k_lstm, dtype=jnp.float32)
    w_hh = jax.random.uniform(ks[1], (4 * H, H), minval=-k_lstm, maxval=k_lstm, dtype=jnp.float32)
    b_ih = jax.random.uniform(ks[2], (4 * H,), minval=-k_lstm, maxval=k_lstm, dtype=jnp.float32)
    b_hh = jax.random.uniform(ks[3], (4 * H,), minval=-k_lstm, maxval=k_lstm, dtype=jnp.float32)
    b_ih = b_ih.at[H:2 * H].set(forget_bias / 2)
    b_hh = b_hh.at[H:2 * H].set(forget_bias / 2)

    # nn.Linear(hidden_size, output_size)
    w_lin = jax.random.uniform(ks[4], (O, H), minval=-k_lin, maxval=k_lin, dtype=jnp.float32)
    b_lin = jax.random.uniform(ks[5], (O,), minval=-k_lin, maxval=k_lin, dtype=jnp.float32)

    params = {
        "w_ih_T": w_ih.T,                       # (I, 4H)
        "w_hh_T": w_hh.T,                       # (H, 4H)
        "b_lstm": (b_ih + b_hh)[None, :],       # (1, 4H)
        "w_lin_T": w_lin.T,                     # (H, O)
        "b_lin": b_lin[None, :],                # (1, O)
    }

    data = jax.random.normal(ks[6], (B, T, I), dtype=jnp.float32)
    hidden0 = (jnp.zeros((B, H), jnp.float32), jnp.zeros((B, H), jnp.float32))  # init_state

    decoded, (h_last, c_last) = model_forward(params, data, hidden0)
    jax.block_until_ready((decoded, h_last, c_last))

    ref_dec, (ref_h, ref_c) = ref_forward(w_ih, w_hh, b_ih, b_hh, w_lin, b_lin, data, hidden0)

    assert decoded.shape == (B, T, O)
    assert jnp.allclose(decoded, ref_dec, atol=1e-4, rtol=1e-4)
    assert jnp.allclose(h_last, ref_h, atol=1e-4, rtol=1e-4)
    assert jnp.allclose(c_last, ref_c, atol=1e-4, rtol=1e-4)

    print("KERNEL_OK")
</pallas_src>

<mosaic_0001>
module attributes {stable_mosaic.version = 11 : i64} {
  func.func @fused_lstm_decode_kernel(%arg0: memref<16x16xf32, #tpu.memory_space<vmem>>, %arg1: memref<16x128xf32, #tpu.memory_space<vmem>>, %arg2: memref<32x128xf32, #tpu.memory_space<vmem>>, %arg3: memref<1x128xf32, #tpu.memory_space<vmem>>, %arg4: memref<32x10xf32, #tpu.memory_space<vmem>>, %arg5: memref<1x10xf32, #tpu.memory_space<vmem>>, %arg6: memref<2x32xf32, #tpu.memory_space<vmem>>, %arg7: memref<2x32xf32, #tpu.memory_space<vmem>>, %arg8: memref<2x8x10xf32, #tpu.memory_space<vmem>>, %arg9: memref<2x32xf32, #tpu.memory_space<vmem>>, %arg10: memref<2x32xf32, #tpu.memory_space<vmem>>, %arg11: memref<2x8x32xf32, #tpu.memory_space<vmem>>) attributes {dimension_semantics = [], scalar_prefetch = 0 : i64, scratch_operands = 1 : i64, tpu.core_type = #tpu.core_type<tc>} {
    %c0 = arith.constant 0 : index
    %c0_0 = arith.constant 0 : index
    %0 = vector.load %arg2[%c0, %c0_0] : memref<32x128xf32, #tpu.memory_space<vmem>>, vector<32x128xf32>
    %c0_1 = arith.constant 0 : index
    %c0_2 = arith.constant 0 : index
    %1 = vector.load %arg4[%c0_1, %c0_2] : memref<32x10xf32, #tpu.memory_space<vmem>>, vector<32x10xf32>
    %c0_3 = arith.constant 0 : index
    %c0_4 = arith.constant 0 : index
    %2 = vector.load %arg5[%c0_3, %c0_4] : memref<1x10xf32, #tpu.memory_space<vmem>>, vector<1x10xf32>
    %c0_5 = arith.constant 0 : index
    %c0_6 = arith.constant 0 : index
    %3 = vector.load %arg0[%c0_5, %c0_6] : memref<16x16xf32, #tpu.memory_space<vmem>>, vector<16x16xf32>
    %c0_7 = arith.constant 0 : index
    %c0_8 = arith.constant 0 : index
    %4 = vector.load %arg1[%c0_7, %c0_8] : memref<16x128xf32, #tpu.memory_space<vmem>>, vector<16x128xf32>
    %cst = arith.constant dense<0.000000e+00> : vector<16x128xf32>
    %5 = tpu.matmul %3, %4, %cst {dimension_numbers = #tpu.dot_dimension_numbers<[1], [0], [0], [1], [0, 0, 1, 1], [], []>} : vector<16x16xf32>, vector<16x128xf32>, vector<16x128xf32> -> vector<16x128xf32>
    %c0_9 = arith.constant 0 : index
    %c0_10 = arith.constant 0 : index
    %6 = vector.load %arg3[%c0_9, %c0_10] : memref<1x128xf32, #tpu.memory_space<vmem>>, vector<1x128xf32>
    %7 = vector.broadcast %6 : vector<1x128xf32> to vector<16x128xf32>
    %8 = arith.addf %5, %7 : vector<16x128xf32>
    %c0_11 = arith.constant 0 : index
    %c0_12 = arith.constant 0 : index
    %9 = vector.load %arg6[%c0_11, %c0_12] : memref<2x32xf32, #tpu.memory_space<vmem>>, vector<2x32xf32>
    %c0_13 = arith.constant 0 : index
    %c0_14 = arith.constant 0 : index
    %10 = vector.load %arg7[%c0_13, %c0_14] : memref<2x32xf32, #tpu.memory_space<vmem>>, vector<2x32xf32>
    %11 = vector.extract_strided_slice %8 {offsets = [0, 0], sizes = [2, 128], strides = [1, 1]} : vector<16x128xf32> to vector<2x128xf32>
    %cst_15 = arith.constant dense<0.000000e+00> : vector<2x128xf32>
    %12 = tpu.matmul %9, %0, %cst_15 {dimension_numbers = #tpu.dot_dimension_numbers<[1], [0], [0], [1], [0, 0, 1, 1], [], []>} : vector<2x32xf32>, vector<32x128xf32>, vector<2x128xf32> -> vector<2x128xf32>
    %13 = arith.addf %11, %12 : vector<2x128xf32>
    %14 = arith.negf %13 : vector<2x128xf32>
    %15 = math.exp %14 : vector<2x128xf32>
    %cst_16 = arith.constant 1.000000e+00 : f32
    %16 = vector.broadcast %cst_16 : f32 to vector<2x128xf32>
    %17 = arith.addf %16, %15 : vector<2x128xf32>
    %18 = arith.divf %16, %17 : vector<2x128xf32>
    %19 = math.tanh %13 : vector<2x128xf32>
    %20 = vector.extract_strided_slice %18 {offsets = [0, 0], sizes = [2, 32], strides = [1, 1]} : vector<2x128xf32> to vector<2x32xf32>
    %21 = vector.extract_strided_slice %18 {offsets = [0, 32], sizes = [2, 32], strides = [1, 1]} : vector<2x128xf32> to vector<2x32xf32>
    %22 = vector.extract_strided_slice %19 {offsets = [0, 64], sizes = [2, 32], strides = [1, 1]} : vector<2x128xf32> to vector<2x32xf32>
    %23 = vector.extract_strided_slice %18 {offsets = [0, 96], sizes = [2, 32], strides = [1, 1]} : vector<2x128xf32> to vector<2x32xf32>
    %24 = arith.mulf %21, %10 : vector<2x32xf32>
    %25 = arith.mulf %20, %22 : vector<2x32xf32>
    %26 = arith.addf %24, %25 : vector<2x32xf32>
    %27 = math.tanh %26 : vector<2x32xf32>
    %28 = arith.mulf %23, %27 : vector<2x32xf32>
    %29 = vector.shape_cast %26 : vector<2x32xf32> to vector<2x1x32xf32>
    %c0_17 = arith.constant 0 : index
    %c0_18 = arith.constant 0 : index
    %c0_19 = arith.constant 0 : index
    %30 = vector.load %arg11[%c0_17, %c0_18, %c0_19] : memref<2x8x32xf32, #tpu.memory_space<vmem>>, vector<2x1x32xf32>
    tpu.vector_store %arg11[%c0_17, %c0_18, %c0_19], %29 {strides = array<i32>} : memref<2x8x32xf32, #tpu.memory_space<vmem>>, vector<2x1x32xf32>,
    %31 = vector.extract_strided_slice %8 {offsets = [2, 0], sizes = [2, 128], strides = [1, 1]} : vector<16x128xf32> to vector<2x128xf32>
    %cst_20 = arith.constant dense<0.000000e+00> : vector<2x128xf32>
    %32 = tpu.matmul %28, %0, %cst_20 {dimension_numbers = #tpu.dot_dimension_numbers<[1], [0], [0], [1], [0, 0, 1, 1], [], []>} : vector<2x32xf32>, vector<32x128xf32>, vector<2x128xf32> -> vector<2x128xf32>
    %33 = arith.addf %31, %32 : vector<2x128xf32>
    %34 = arith.negf %33 : vector<2x128xf32>
    %35 = math.exp %34 : vector<2x128xf32>
    %cst_21 = arith.constant 1.000000e+00 : f32
    %36 = vector.broadcast %cst_21 : f32 to vector<2x128xf32>
    %37 = arith.addf %36, %35 : vector<2x128xf32>
    %38 = arith.divf %36, %37 : vector<2x128xf32>
    %39 = math.tanh %33 : vector<2x128xf32>
    %40 = vector.extract_strided_slice %38 {offsets = [0, 0], sizes = [2, 32], strides = [1, 1]} : vector<2x128xf32> to vector<2x32xf32>
    %41 = vector.extract_strided_slice %38 {offsets = [0, 32], sizes = [2, 32], strides = [1, 1]} : vector<2x128xf32> to vector<2x32xf32>
    %42 = vector.extract_strided_slice %39 {offsets = [0, 64], sizes = [2, 32], strides = [1, 1]} : vector<2x128xf32> to vector<2x32xf32>
    %43 = vector.extract_strided_slice %38 {offsets = [0, 96], sizes = [2, 32], strides = [1, 1]} : vector<2x128xf32> to vector<2x32xf32>
    %44 = arith.mulf %41, %26 : vector<2x32xf32>
    %45 = arith.mulf %40, %42 : vector<2x32xf32>
    %46 = arith.addf %44, %45 : vector<2x32xf32>
    %47 = math.tanh %46 : vector<2x32xf32>
    %48 = arith.mulf %43, %47 : vector<2x32xf32>
    %49 = vector.shape_cast %46 : vector<2x32xf32> to vector<2x1x32xf32>
    %c0_22 = arith.constant 0 : index
    %c1 = arith.constant 1 : index
    %c0_23 = arith.constant 0 : index
    %50 = vector.load %arg11[%c0_22, %c1, %c0_23] : memref<2x8x32xf32, #tpu.memory_space<vmem>>, vector<2x1x32xf32>
    tpu.vector_store %arg11[%c0_22, %c1, %c0_23], %49 {strides = array<i32>} : memref<2x8x32xf32, #tpu.memory_space<vmem>>, vector<2x1x32xf32>,
    %51 = vector.extract_strided_slice %8 {offsets = [4, 0], sizes = [2, 128], strides = [1, 1]} : vector<16x128xf32> to vector<2x128xf32>
    %cst_24 = arith.constant dense<0.000000e+00> : vector<2x128xf32>
    %52 = tpu.matmul %48, %0, %cst_24 {dimension_numbers = #tpu.dot_dimension_numbers<[1], [0], [0], [1], [0, 0, 1, 1], [], []>} : vector<2x32xf32>, vector<32x128xf32>, vector<2x128xf32> -> vector<2x128xf32>
    %53 = arith.addf %51, %52 : vector<2x128xf32>
    %54 = arith.negf %53 : vector<2x128xf32>
    %55 = math.exp %54 : vector<2x128xf32>
    %cst_25 = arith.constant 1.000000e+00 : f32
    %56 = vector.broadcast %cst_25 : f32 to vector<2x128xf32>
    %57 = arith.addf %56, %55 : vector<2x128xf32>
    %58 = arith.divf %56, %57 : vector<2x128xf32>
    %59 = math.tanh %53 : vector<2x128xf32>
    %60 = vector.extract_strided_slice %58 {offsets = [0, 0], sizes = [2, 32], strides = [1, 1]} : vector<2x128xf32> to vector<2x32xf32>
    %61 = vector.extract_strided_slice %58 {offsets = [0, 32], sizes = [2, 32], strides = [1, 1]} : vector<2x128xf32> to vector<2x32xf32>
    %62 = vector.extract_strided_slice %59 {offsets = [0, 64], sizes = [2, 32], strides = [1, 1]} : vector<2x128xf32> to vector<2x32xf32>
    %63 = vector.extract_strided_slice %58 {offsets = [0, 96], sizes = [2, 32], strides = [1, 1]} : vector<2x128xf32> to vector<2x32xf32>
    %64 = arith.mulf %61, %46 : vector<2x32xf32>
    %65 = arith.mulf %60, %62 : vector<2x32xf32>
    %66 = arith.addf %64, %65 : vector<2x32xf32>
    %67 = math.tanh %66 : vector<2x32xf32>
    %68 = arith.mulf %63, %67 : vector<2x32xf32>
    %69 = vector.shape_cast %66 : vector<2x32xf32> to vector<2x1x32xf32>
    %c0_26 = arith.constant 0 : index
    %c2 = arith.constant 2 : index
    %c0_27 = arith.constant 0 : index
    %70 = vector.load %arg11[%c0_26, %c2, %c0_27] : memref<2x8x32xf32, #tpu.memory_space<vmem>>, vector<2x1x32xf32>
    tpu.vector_store %arg11[%c0_26, %c2, %c0_27], %69 {strides = array<i32>} : memref<2x8x32xf32, #tpu.memory_space<vmem>>, vector<2x1x32xf32>,
    %71 = vector.extract_strided_slice %8 {offsets = [6, 0], sizes = [2, 128], strides = [1, 1]} : vector<16x128xf32> to vector<2x128xf32>
    %cst_28 = arith.constant dense<0.000000e+00> : vector<2x128xf32>
    %72 = tpu.matmul %68, %0, %cst_28 {dimension_numbers = #tpu.dot_dimension_numbers<[1], [0], [0], [1], [0, 0, 1, 1], [], []>} : vector<2x32xf32>, vector<32x128xf32>, vector<2x128xf32> -> vector<2x128xf32>
    %73 = arith.addf %71, %72 : vector<2x128xf32>
    %74 = arith.negf %73 : vector<2x128xf32>
    %75 = math.exp %74 : vector<2x128xf32>
    %cst_29 = arith.constant 1.000000e+00 : f32
    %76 = vector.broadcast %cst_29 : f32 to vector<2x128xf32>
    %77 = arith.addf %76, %75 : vector<2x128xf32>
    %78 = arith.divf %76, %77 : vector<2x128xf32>
    %79 = math.tanh %73 : vector<2x128xf32>
    %80 = vector.extract_strided_slice %78 {offsets = [0, 0], sizes = [2, 32], strides = [1, 1]} : vector<2x128xf32> to vector<2x32xf32>
    %81 = vector.extract_strided_slice %78 {offsets = [0, 32], sizes = [2, 32], strides = [1, 1]} : vector<2x128xf32> to vector<2x32xf32>
    %82 = vector.extract_strided_slice %79 {offsets = [0, 64], sizes = [2, 32], strides = [1, 1]} : vector<2x128xf32> to vector<2x32xf32>
    %83 = vector.extract_strided_slice %78 {offsets = [0, 96], sizes = [2, 32], strides = [1, 1]} : vector<2x128xf32> to vector<2x32xf32>
    %84 = arith.mulf %81, %66 : vector<2x32xf32>
    %85 = arith.mulf %80, %82 : vector<2x32xf32>
    %86 = arith.addf %84, %85 : vector<2x32xf32>
    %87 = math.tanh %86 : vector<2x32xf32>
    %88 = arith.mulf %83, %87 : vector<2x32xf32>
    %89 = vector.shape_cast %86 : vector<2x32xf32> to vector<2x1x32xf32>
    %c0_30 = arith.constant 0 : index
    %c3 = arith.constant 3 : index
    %c0_31 = arith.constant 0 : index
    %90 = vector.load %arg11[%c0_30, %c3, %c0_31] : memref<2x8x32xf32, #tpu.memory_space<vmem>>, vector<2x1x32xf32>
    tpu.vector_store %arg11[%c0_30, %c3, %c0_31], %89 {strides = array<i32>} : memref<2x8x32xf32, #tpu.memory_space<vmem>>, vector<2x1x32xf32>,
    %91 = vector.extract_strided_slice %8 {offsets = [8, 0], sizes = [2, 128], strides = [1, 1]} : vector<16x128xf32> to vector<2x128xf32>
    %cst_32 = arith.constant dense<0.000000e+00> : vector<2x128xf32>
    %92 = tpu.matmul %88, %0, %cst_32 {dimension_numbers = #tpu.dot_dimension_numbers<[1], [0], [0], [1], [0, 0, 1, 1], [], []>} : vector<2x32xf32>, vector<32x128xf32>, vector<2x128xf32> -> vector<2x128xf32>
    %93 = arith.addf %91, %92 : vector<2x128xf32>
    %94 = arith.negf %93 : vector<2x128xf32>
    %95 = math.exp %94 : vector<2x128xf32>
    %cst_33 = arith.constant 1.000000e+00 : f32
    %96 = vector.broadcast %cst_33 : f32 to vector<2x128xf32>
    %97 = arith.addf %96, %95 : vector<2x128xf32>
    %98 = arith.divf %96, %97 : vector<2x128xf32>
    %99 = math.tanh %93 : vector<2x128xf32>
    %100 = vector.extract_strided_slice %98 {offsets = [0, 0], sizes = [2, 32], strides = [1, 1]} : vector<2x128xf32> to vector<2x32xf32>
    %101 = vector.extract_strided_slice %98 {offsets = [0, 32], sizes = [2, 32], strides = [1, 1]} : vector<2x128xf32> to vector<2x32xf32>
    %102 = vector.extract_strided_slice %99 {offsets = [0, 64], sizes = [2, 32], strides = [1, 1]} : vector<2x128xf32> to vector<2x32xf32>
    %103 = vector.extract_strided_slice %98 {offsets = [0, 96], sizes = [2, 32], strides = [1, 1]} : vector<2x128xf32> to vector<2x32xf32>
    %104 = arith.mulf %101, %86 : vector<2x32xf32>
    %105 = arith.mulf %100, %102 : vector<2x32xf32>
    %106 = arith.addf %104, %105 : vector<2x32xf32>
    %107 = math.tanh %106 : vector<2x32xf32>
    %108 = arith.mulf %103, %107 : vector<2x32xf32>
    %109 = vector.shape_cast %106 : vector<2x32xf32> to vector<2x1x32xf32>
    %c0_34 = arith.constant 0 : index
    %c4 = arith.constant 4 : index
    %c0_35 = arith.constant 0 : index
    %110 = vector.load %arg11[%c0_34, %c4, %c0_35] : memref<2x8x32xf32, #tpu.memory_space<vmem>>, vector<2x1x32xf32>
    tpu.vector_store %arg11[%c0_34, %c4, %c0_35], %109 {strides = array<i32>} : memref<2x8x32xf32, #tpu.memory_space<vmem>>, vector<2x1x32xf32>,
    %111 = vector.extract_strided_slice %8 {offsets = [10, 0], sizes = [2, 128], strides = [1, 1]} : vector<16x128xf32> to vector<2x128xf32>
    %cst_36 = arith.constant dense<0.000000e+00> : vector<2x128xf32>
    %112 = tpu.matmul %108, %0, %cst_36 {dimension_numbers = #tpu.dot_dimension_numbers<[1], [0], [0], [1], [0, 0, 1, 1], [], []>} : vector<2x32xf32>, vector<32x128xf32>, vector<2x128xf32> -> vector<2x128xf32>
    %113 = arith.addf %111, %112 : vector<2x128xf32>
    %114 = arith.negf %113 : vector<2x128xf32>
    %115 = math.exp %114 : vector<2x128xf32>
    %cst_37 = arith.constant 1.000000e+00 : f32
    %116 = vector.broadcast %cst_37 : f32 to vector<2x128xf32>
    %117 = arith.addf %116, %115 : vector<2x128xf32>
    %118 = arith.divf %116, %117 : vector<2x128xf32>
    %119 = math.tanh %113 : vector<2x128xf32>
    %120 = vector.extract_strided_slice %118 {offsets = [0, 0], sizes = [2, 32], strides = [1, 1]} : vector<2x128xf32> to vector<2x32xf32>
    %121 = vector.extract_strided_slice %118 {offsets = [0, 32], sizes = [2, 32], strides = [1, 1]} : vector<2x128xf32> to vector<2x32xf32>
    %122 = vector.extract_strided_slice %119 {offsets = [0, 64], sizes = [2, 32], strides = [1, 1]} : vector<2x128xf32> to vector<2x32xf32>
    %123 = vector.extract_strided_slice %118 {offsets = [0, 96], sizes = [2, 32], strides = [1, 1]} : vector<2x128xf32> to vector<2x32xf32>
    %124 = arith.mulf %121, %106 : vector<2x32xf32>
    %125 = arith.mulf %120, %122 : vector<2x32xf32>
    %126 = arith.addf %124, %125 : vector<2x32xf32>
    %127 = math.tanh %126 : vector<2x32xf32>
    %128 = arith.mulf %123, %127 : vector<2x32xf32>
    %129 = vector.shape_cast %126 : vector<2x32xf32> to vector<2x1x32xf32>
    %c0_38 = arith.constant 0 : index
    %c5 = arith.constant 5 : index
    %c0_39 = arith.constant 0 : index
    %130 = vector.load %arg11[%c0_38, %c5, %c0_39] : memref<2x8x32xf32, #tpu.memory_space<vmem>>, vector<2x1x32xf32>
    tpu.vector_store %arg11[%c0_38, %c5, %c0_39], %129 {strides = array<i32>} : memref<2x8x32xf32, #tpu.memory_space<vmem>>, vector<2x1x32xf32>,
    %131 = vector.extract_strided_slice %8 {offsets = [12, 0], sizes = [2, 128], strides = [1, 1]} : vector<16x128xf32> to vector<2x128xf32>
    %cst_40 = arith.constant dense<0.000000e+00> : vector<2x128xf32>
    %132 = tpu.matmul %128, %0, %cst_40 {dimension_numbers = #tpu.dot_dimension_numbers<[1], [0], [0], [1], [0, 0, 1, 1], [], []>} : vector<2x32xf32>, vector<32x128xf32>, vector<2x128xf32> -> vector<2x128xf32>
    %133 = arith.addf %131, %132 : vector<2x128xf32>
    %134 = arith.negf %133 : vector<2x128xf32>
    %135 = math.exp %134 : vector<2x128xf32>
    %cst_41 = arith.constant 1.000000e+00 : f32
    %136 = vector.broadcast %cst_41 : f32 to vector<2x128xf32>
    %137 = arith.addf %136, %135 : vector<2x128xf32>
    %138 = arith.divf %136, %137 : vector<2x128xf32>
    %139 = math.tanh %133 : vector<2x128xf32>
    %140 = vector.extract_strided_slice %138 {offsets = [0, 0], sizes = [2, 32], strides = [1, 1]} : vector<2x128xf32> to vector<2x32xf32>
    %141 = vector.extract_strided_slice %138 {offsets = [0, 32], sizes = [2, 32], strides = [1, 1]} : vector<2x128xf32> to vector<2x32xf32>
    %142 = vector.extract_strided_slice %139 {offsets = [0, 64], sizes = [2, 32], strides = [1, 1]} : vector<2x128xf32> to vector<2x32xf32>
    %143 = vector.extract_strided_slice %138 {offsets = [0, 96], sizes = [2, 32], strides = [1, 1]} : vector<2x128xf32> to vector<2x32xf32>
    %144 = arith.mulf %141, %126 : vector<2x32xf32>
    %145 = arith.mulf %140, %142 : vector<2x32xf32>
    %146 = arith.addf %144, %145 : vector<2x32xf32>
    %147 = math.tanh %146 : vector<2x32xf32>
    %148 = arith.mulf %143, %147 : vector<2x32xf32>
    %149 = vector.shape_cast %146 : vector<2x32xf32> to vector<2x1x32xf32>
    %c0_42 = arith.constant 0 : index
    %c6 = arith.constant 6 : index
    %c0_43 = arith.constant 0 : index
    %150 = vector.load %arg11[%c0_42, %c6, %c0_43] : memref<2x8x32xf32, #tpu.memory_space<vmem>>, vector<2x1x32xf32>
    tpu.vector_store %arg11[%c0_42, %c6, %c0_43], %149 {strides = array<i32>} : memref<2x8x32xf32, #tpu.memory_space<vmem>>, vector<2x1x32xf32>,
    %151 = vector.extract_strided_slice %8 {offsets = [14, 0], sizes = [2, 128], strides = [1, 1]} : vector<16x128xf32> to vector<2x128xf32>
    %cst_44 = arith.constant dense<0.000000e+00> : vector<2x128xf32>
    %152 = tpu.matmul %148, %0, %cst_44 {dimension_numbers = #tpu.dot_dimension_numbers<[1], [0], [0], [1], [0, 0, 1, 1], [], []>} : vector<2x32xf32>, vector<32x128xf32>, vector<2x128xf32> -> vector<2x128xf32>
    %153 = arith.addf %151, %152 : vector<2x128xf32>
    %154 = arith.negf %153 : vector<2x128xf32>
    %155 = math.exp %154 : vector<2x128xf32>
    %cst_45 = arith.constant 1.000000e+00 : f32
    %156 = vector.broadcast %cst_45 : f32 to vector<2x128xf32>
    %157 = arith.addf %156, %155 : vector<2x128xf32>
    %158 = arith.divf %156, %157 : vector<2x128xf32>
    %159 = math.tanh %153 : vector<2x128xf32>
    %160 = vector.extract_strided_slice %158 {offsets = [0, 0], sizes = [2, 32], strides = [1, 1]} : vector<2x128xf32> to vector<2x32xf32>
    %161 = vector.extract_strided_slice %158 {offsets = [0, 32], sizes = [2, 32], strides = [1, 1]} : vector<2x128xf32> to vector<2x32xf32>
    %162 = vector.extract_strided_slice %159 {offsets = [0, 64], sizes = [2, 32], strides = [1, 1]} : vector<2x128xf32> to vector<2x32xf32>
    %163 = vector.extract_strided_slice %158 {offsets = [0, 96], sizes = [2, 32], strides = [1, 1]} : vector<2x128xf32> to vector<2x32xf32>
    %164 = arith.mulf %161, %146 : vector<2x32xf32>
    %165 = arith.mulf %160, %162 : vector<2x32xf32>
    %166 = arith.addf %164, %165 : vector<2x32xf32>
    %167 = math.tanh %166 : vector<2x32xf32>
    %168 = arith.mulf %163, %167 : vector<2x32xf32>
    %169 = vector.shape_cast %166 : vector<2x32xf32> to vector<2x1x32xf32>
    %c0_46 = arith.constant 0 : index
    %c7 = arith.constant 7 : index
    %c0_47 = arith.constant 0 : index
    %170 = vector.load %arg11[%c0_46, %c7, %c0_47] : memref<2x8x32xf32, #tpu.memory_space<vmem>>, vector<2x1x32xf32>
    tpu.vector_store %arg11[%c0_46, %c7, %c0_47], %169 {strides = array<i32>} : memref<2x8x32xf32, #tpu.memory_space<vmem>>, vector<2x1x32xf32>,
    %c0_48 = arith.constant 0 : index
    %c0_49 = arith.constant 0 : index
    %c0_50 = arith.constant 0 : index
    %171 = vector.load %arg11[%c0_48, %c0_49, %c0_50] : memref<2x8x32xf32, #tpu.memory_space<vmem>>, vector<1x8x32xf32>
    %172 = vector.shape_cast %171 : vector<1x8x32xf32> to vector<8x32xf32>
    %cst_51 = arith.constant dense<0.000000e+00> : vector<8x10xf32>
    %173 = tpu.matmul %172, %1, %cst_51 {dimension_numbers = #tpu.dot_dimension_numbers<[1], [0], [0], [1], [0, 0, 1, 1], [], []>} : vector<8x32xf32>, vector<32x10xf32>, vector<8x10xf32> -> vector<8x10xf32>
    %174 = vector.broadcast %2 : vector<1x10xf32> to vector<8x10xf32>
    %175 = arith.addf %173, %174 : vector<8x10xf32>
    %c0_52 = arith.constant 0 : index
    %c0_53 = arith.constant 0 : index
    %c0_54 = arith.constant 0 : index
    %176 = vector.load %arg8[%c0_52, %c0_53, %c0_54] : memref<2x8x10xf32, #tpu.memory_space<vmem>>, vector<1x8x10xf32>
    %177 = vector.shape_cast %176 : vector<1x8x10xf32> to vector<8x10xf32>
    %178 = vector.shape_cast %175 : vector<8x10xf32> to vector<1x8x10xf32>
    tpu.vector_store %arg8[%c0_52, %c0_53, %c0_54], %178 {strides = array<i32>} : memref<2x8x10xf32, #tpu.memory_space<vmem>>, vector<1x8x10xf32>,
    %c1_55 = arith.constant 1 : index
    %c0_56 = arith.constant 0 : index
    %c0_57 = arith.constant 0 : index
    %179 = vector.load %arg11[%c1_55, %c0_56, %c0_57] : memref<2x8x32xf32, #tpu.memory_space<vmem>>, vector<1x8x32xf32>
    %180 = vector.shape_cast %179 : vector<1x8x32xf32> to vector<8x32xf32>
    %cst_58 = arith.constant dense<0.000000e+00> : vector<8x10xf32>
    %181 = tpu.matmul %180, %1, %cst_58 {dimension_numbers = #tpu.dot_dimension_numbers<[1], [0], [0], [1], [0, 0, 1, 1], [], []>} : vector<8x32xf32>, vector<32x10xf32>, vector<8x10xf32> -> vector<8x10xf32>
    %182 = vector.broadcast %2 : vector<1x10xf32> to vector<8x10xf32>
    %183 = arith.addf %181, %182 : vector<8x10xf32>
    %c1_59 = arith.constant 1 : index
    %c0_60 = arith.constant 0 : index
    %c0_61 = arith.constant 0 : index
    %184 = vector.load %arg8[%c1_59, %c0_60, %c0_61] : memref<2x8x10xf32, #tpu.memory_space<vmem>>, vector<1x8x10xf32>
    %185 = vector.shape_cast %184 : vector<1x8x10xf32> to vector<8x10xf32>
    %186 = vector.shape_cast %183 : vector<8x10xf32> to vector<1x8x10xf32>
    tpu.vector_store %arg8[%c1_59, %c0_60, %c0_61], %186 {strides = array<i32>} : memref<2x8x10xf32, #tpu.memory_space<vmem>>, vector<1x8x10xf32>,
    %c0_62 = arith.constant 0 : index
    %c0_63 = arith.constant 0 : index
    %187 = vector.load %arg9[%c0_62, %c0_63] : memref<2x32xf32, #tpu.memory_space<vmem>>, vector<2x32xf32>
    tpu.vector_store %arg9[%c0_62, %c0_63], %168 {strides = array<i32>} : memref<2x32xf32, #tpu.memory_space<vmem>>, vector<2x32xf32>,
    %c0_64 = arith.constant 0 : index
    %c0_65 = arith.constant 0 : index
    %188 = vector.load %arg10[%c0_64, %c0_65] : memref<2x32xf32, #tpu.memory_space<vmem>>, vector<2x32xf32>
    tpu.vector_store %arg10[%c0_64, %c0_65], %166 {strides = array<i32>} : memref<2x32xf32, #tpu.memory_space<vmem>>, vector<2x32xf32>,
    return
  }
}

</mosaic_0001>

<bundles_post_ra>
// kernel: tpu_custom_call.1
= control target key start
LH: loop header
LB: loop body
LE: loop exit
PB: predicated region body
PF: predicated region fallthrough
CT: control target
= control target key end

     0   :  { %16 = vsyncpa [#allocation4], 0  ;;  %s2359_s0 = inlined_call_operand.vmem [shape: f32[16,16], index: 0, kind: input, shape index: {}]   ;;  %s2360_s1 = inlined_call_operand.hbm [shape: f32[16,128], index: 1, kind: input, shape index: {}]   ;;  %s2361_s2 = inlined_call_operand.vmem [shape: f32[32,128], index: 2, kind: input, shape index: {}]   ;;  %s2362_s3 = inlined_call_operand.vmem [shape: f32[1,128], index: 3, kind: input, shape index: {}]   ;;  %s2363_s4 = inlined_call_operand.vmem [shape: f32[32,10], index: 4, kind: input, shape index: {}]   ;;  %s2364_s5 = inlined_call_operand.vmem [shape: f32[1,10], index: 5, kind: input, shape index: {}]   ;;  %s2365_s6 = inlined_call_operand.vmem [shape: f32[2,32], index: 6, kind: input, shape index: {}]   ;;  %s2366_s7 = inlined_call_operand.vmem [shape: f32[2,32], index: 7, kind: input, shape index: {}]   ;;  %s2367_s8 = inlined_call_operand.hbm [shape: f32[2,8,10], index: 8, kind: output, shape index: {0}]   ;;  %s2368_s9 = inlined_call_operand.hbm [shape: f32[2,32], index: 9, kind: output, shape index: {1}]   ;;  %s2369_s10 = inlined_call_operand.hbm [shape: f32[2,32], index: 10, kind: output, shape index: {2}]  }
   0x1   :  { %17 = vsyncpa [#allocation5], 0 }
   0x2   :  { %18 = vsyncpa [#allocation8], 0  ;;  %s1958_s13 = smov [#allocation3]   ;;  %s1864_s17 = scalar_lea.hbm %s2360_s1, 256 }
   0x3   :  { %s26_s14 = sshll.u32 %s1958_s13, 4  ;;  %p1865_p0 = scmp.ne.s32.totalorder %s2360_s1, %s1864_s17  ;;  %s27_s14 = int_to_ptr.vmem [resolvable:$true] %s26_s14 }
   0x4   :  { %p1868_p1 = scmp.lt.u32.totalorder %s1864_s17, %s2360_s1 }
   0x6   :  { %p1870_p2 = pnand %p1868_p1, %p1865_p0 }
   0x8   :  { %1873 = shalt.err (!%p1870_p2)
}
   0x9   :  { %s1874_s22 = scalar_lea.vmem %s27_s14, 256  ;;  %p1879_p4 = scmp.lt.s32.totalorder %s27_s14, %s27_s14 }
   0xa   :  { %p1875_p3 = scmp.ne.s32.totalorder %s27_s14, %s1874_s22  ;;  %p1880_p5 = scmp.lt.s32.totalorder %s1874_s22, %s1874_s22 }
   0xc   :  { %p1881_p6 = por %p1880_p5, %p1879_p4 }
   0xe   :  { %p1882_p7 = pnand %p1881_p6, %p1875_p3 }
  0x10   :  { %1885 = shalt.err (!%p1882_p7)
}
  0x11   :  { %s1959_s23 = smov 128   ;;  %s1960_s24 = smov 8  }
  0x12   :  { %32 = dma.hbm_to_vmem [thread:$0]  %s2360_s1, 256, %s27_s14, [#allocation4], %s1959_s23, %s1959_s23, %s1960_s24  }
  0x13   :  { %1952 = dma.done.wait [#allocation4], 256  }
  0x14   :  { %1953 = vsyncadd [#allocation4], 4294967040  ;;  %v1961_v0 = vmov 0.0|0.0   ;;  %vm1962_vm0 = vmmov 0   ;;  %v1963_v1 = vmov 0.0   ;;  %vm68_vm1 = vcmask 130048  }
  0x15   :  { %1727 = vmatprep.subr.bf16.mxu1 %v1961_v0  ;;  %1621 = vmatprep.mubr.msk.f32.mxu1 %vm1962_vm0, %v1963_v1  ;;  %v59_v2 = vld [vmem:[#allocation3] sm:$0xff]  ;;  %v60_v3 = vld [vmem:[#allocation3 + $0x8] sm:$0xff]  ;;  %v48_v4 = vld [vmem:[%s2361_s2] sm:$0xff]  ;;  %vm152_vm2 = vcmask 261120   ;;  %s1964_s19 = smov 64   ;;  %vm292_vm3 = vcmask 253952  }
  0x16   :  { %v1723_v5 = vpack.c.bf16 %v60_v3, %v59_v2  ;;  %v49_v6 = vld [vmem:[%s2361_s2 + $0x8] sm:$0xff]  ;;  %v57_v7 = vld [vmem:[%s2359_s0] sm:$0xff]  ;;  %v50_v9 = vld [vmem:[%s2361_s2 + $0x10] sm:$0xff]  ;;  %vm1480_vm4 = vcmask 261126   ;;  %s1969_s12 = smov [#allocation9]  }
  0x17   :  { %v2053_v8 = vpack.c.bf16 %v49_v6, %v48_v4  ;;  %1610 = vmatprep.mubr.msk.f32.mxu0 %vm68_vm1, %v57_v7  ;;  %v51_v10 = vld [vmem:[%s2361_s2 + $0x18] sm:$0xff]  ;;  %v58_v11 = vld [vmem:[%s2359_s0 + $0x8] sm:$0xff]  ;;  %v150_v13 = vld [vmem:[%s2365_s6] sm:$0x3]  ;;  %s1514_s13 = sshll.u32 %s1969_s12, 4  ;;  %s1515_s13 = int_to_ptr.vmem [resolvable:$true] %s1514_s13 }
  0x18   :  { %1724 = vmatprep.subr.bf16.mxu0 %v1723_v5  ;;  %v2066_v12 = vpack.c.bf16 %v51_v10, %v50_v9  ;;  %v1530_v14 = vld [vmem:[%s2362_s3] ss:$0 sm:$0xff]  ;;  %s1965_s3 = smov 32  }
  0x19   :  { %1729 = vmatpush3.bf16.msra.mxu1 %v2053_v8  ;;  %1726 = vmatpush3.bf16.msra.mxu0 %v1723_v5  ;;  %v151_v23 = vld [vmem:[%s2366_s7] sm:$0x3]  ;;  %s1967_s7 = smov 96  }
  0x1a   :  { %1730 = vmatprep.subr.bf16.mxu1 %v1961_v0  ;;  %1733 = vmatprep.subr.bf16.mxu0 %v1961_v0 }
  0x1c   :  { %1611 = vmatmul.mubr.msk.f32.vlgmr.msra.gmra.mrb[0].mxu0 %vm68_vm1, %v58_v11 }
  0x1d   :  { %1732 = vmatpush3.bf16.msra.mxu1 %v2066_v12  ;;  %1735 = vmatpush3.bf16.msra.mxu0 %v2053_v8 }
  0x1e   :  { %1736 = vmatprep.subr.bf16.mxu0 %v1961_v0  ;;  %1632 = vmatprep.mubr.msk.f32.mxu0 %vm1962_vm0, %v1963_v1 }
  0x1f   :  { %1739 = vmatprep.subr.bf16.mxu1 %v1961_v0 }
  0x20   :  { %1622 = vmatmul.mubr.msk.f32.vlgmr.msra.gmra.mrb[0].mxu1 %vm152_vm2, %v150_v13 }
  0x21   :  { %1738 = vmatpush3.bf16.msra.mxu0 %v2066_v12  ;;  %1741 = vmatpush3.bf16.msra.mxu1 %v2053_v8 }
  0x22   :  { %1742 = vmatprep.subr.bf16.mxu1 %v1961_v0  ;;  %1643 = vmatprep.mubr.msk.f32.mxu1 %vm1962_vm0, %v1963_v1 }
  0x23   :  { %1745 = vmatprep.subr.bf16.mxu0 %v1961_v0 }
  0x25   :  { %1744 = vmatpush3.bf16.msra.mxu1 %v2066_v12 }
  0x26   :  { %1751 = vmatprep.subr.bf16.mxu1 %v1961_v0 }
  0xef   :  { %v1612_v15 = vpop.f32.mrb[0].mxu0 }
  0xf0   :  { %v2092_v16 = vadd.f32 %v1612_v15, %v1530_v14  ;;  %v141_v17 = vpop.f32.mrb[1].mxu0 }
  0xf1   :  { %v2094_v18 = vadd.f32 %v1530_v14, %v141_v17 }
  0xf3   :  { %v222_v19 = vpop.f32.mrb[0].mxu1 }
  0xf4   :  { %v226_v20 = vadd.f32 %v222_v19, %v2094_v18  ;;  %v1623_v21 = vpop.f32.mrb[1].mxu1 }
  0xf6   :  { %1800 = vtanh.f32 %v226_v20  ;;  %v1534_v24 = vmul.f32 -1.442695, %v226_v20 }
  0xf8   :  { %1802 = vpow2.f32 %v1534_v24 }
 0x100   :  { %v1801_v22 = vpop.eup %1800 }
 0x101   :  { %240 = vrot.lane.b32.xlu0 %v1801_v22, %s1964_s19 }
 0x102   :  { %v1803_v25 = vpop.eup %1802 }
 0x103   :  { %v230_v26 = vadd.f32 1.0, %v1803_v25 }
 0x105   :  { %235 = vrot.lane.b32.xlu0 %v151_v23, %s1965_s3  ;;  %1804 = vrcp.f32 %v230_v26 }
 0x10f   :  { %v1805_v27 = vpop.eup %1804 }
 0x173   :  { %v241_v28 = vpop.permute.xlu0 %240 }
 0x174   :  { %v243_v29 = vmul.f32 %v1805_v27, %v241_v28 }
 0x176   :  { %245 = vrot.lane.b32.xlu1 %v243_v29, %s1965_s3 }
 0x177   :  { %v236_v30 = vpop.permute.xlu0 %235 }
 0x178   :  { %v238_v31 = vmul.f32 %v1805_v27, %v236_v30 }
 0x1e8   :  { %v246_v32 = vpop.permute.xlu1 %245 }
 0x1e9   :  { %v2103_v33 = vadd.f32 %v246_v32, %v238_v31 }
 0x1eb   :  { %1806 = vtanh.f32 %v2103_v33  ;;  %v381_v49 = vrot.slane %v2103_v33, 6 }
 0x1f5   :  { %v1807_v34 = vpop.eup %1806 }
 0x1f6   :  { %251 = vrot.lane.b32.xlu1 %v1807_v34, %s1964_s19 }
 0x268   :  { %v252_v35 = vpop.permute.xlu1 %251 }
 0x269   :  { %v254_v36 = vmul.f32 %v1805_v27, %v252_v35 }
 0x26b   :  { %296 = vrot.lane.b32.xlu0 %v254_v36, %s1965_s3 }
 0x2dd   :  { %v297_v37 = vpop.permute.xlu0 %296 }
 0x2de   :  { %1633 = vmatmul.mubr.msk.f32.vlgmr.msra.gmra.mrb[2].mxu0 %vm152_vm2, %v297_v37 }
 0x2df   :  { %1747 = vmatpush3.bf16.msra.mxu0 %v2053_v8  ;;  %1654 = vmatprep.mubr.msk.f32.mxu0 %vm1962_vm0, %v1963_v1 }
 0x2e0   :  { %1748 = vmatprep.subr.bf16.mxu0 %v1961_v0 }
 0x2e3   :  { %1750 = vmatpush3.bf16.msra.mxu0 %v2066_v12 }
 0x2e4   :  { %1757 = vmatprep.subr.bf16.mxu0 %v1961_v0 }
 0x3b1   :  { %v366_v38 = vpop.f32.mrb[2].mxu0 }
 0x3b2   :  { %v371_v39 = vrot.slane %v366_v38, 6  ;;  %v1634_v40 = vpop.f32.mrb[3].mxu0 }
 0x3b4   :  { %v373_v41 = vadd.f32 %v371_v39, %v2094_v18 }
 0x3b6   :  { %1808 = vtanh.f32 %v373_v41  ;;  %v1536_v43 = vmul.f32 -1.442695, %v373_v41 }
 0x3b8   :  { %1810 = vpow2.f32 %v1536_v43 }
 0x3c0   :  { %v1809_v42 = vpop.eup %1808 }
 0x3c1   :  { %385 = vrot.lane.b32.xlu1 %v1809_v42, %s1964_s19 }
 0x3c2   :  { %v1811_v44 = vpop.eup %1810 }
 0x3c3   :  { %v377_v45 = vadd.f32 1.0, %v1811_v44 }
 0x3c5   :  { %1812 = vrcp.f32 %v377_v45 }
 0x3cf   :  { %v1813_v46 = vpop.eup %1812 }
 0x3d0   :  { %v383_v50 = vmul.f32 %v1813_v46, %v381_v49 }
 0x433   :  { %v386_v47 = vpop.permute.xlu1 %385 }
 0x434   :  { %v388_v48 = vmul.f32 %v1813_v46, %v386_v47 }
 0x436   :  { %390 = vrot.lane.b32.xlu0 %v388_v48, %s1965_s3 }
 0x4a8   :  { %v391_v51 = vpop.permute.xlu0 %390 }
 0x4a9   :  { %v2119_v52 = vadd.f32 %v391_v51, %v383_v50 }
 0x4ab   :  { %1814 = vtanh.f32 %v2119_v52  ;;  %v528_v7 = vrot.slane %v2119_v52, 6 }
 0x4b5   :  { %v1815_v53 = vpop.eup %1814 }
 0x4b6   :  { %396 = vrot.lane.b32.xlu1 %v1815_v53, %s1964_s19 }
 0x528   :  { %v397_v54 = vpop.permute.xlu1 %396 }
 0x529   :  { %v399_v55 = vmul.f32 %v1813_v46, %v397_v54 }
 0x52b   :  { %v442_v56 = vrot.slane %v399_v55, 2 }
 0x52d   :  { %443 = vrot.lane.b32.xlu0 %v442_v56, %s1965_s3 }
 0x59f   :  { %v444_v57 = vpop.permute.xlu0 %443 }
 0x5a0   :  { %1644 = vmatmul.mubr.msk.f32.vlgmr.msra.gmra.mrb[2].mxu1 %vm152_vm2, %v444_v57 }
 0x5a1   :  { %1753 = vmatpush3.bf16.msra.mxu1 %v2053_v8  ;;  %1665 = vmatprep.mubr.msk.f32.mxu1 %vm1962_vm0, %v1963_v1 }
 0x5a2   :  { %1754 = vmatprep.subr.bf16.mxu1 %v1961_v0 }
 0x5a5   :  { %1756 = vmatpush3.bf16.msra.mxu1 %v2066_v12 }
 0x5a6   :  { %1763 = vmatprep.subr.bf16.mxu1 %v1961_v0 }
 0x673   :  { %v513_v58 = vpop.f32.mrb[2].mxu1 }
 0x674   :  { %v518_v59 = vrot.slane %v513_v58, 4  ;;  %v1645_v60 = vpop.f32.mrb[3].mxu1 }
 0x676   :  { %v520_v61 = vadd.f32 %v518_v59, %v2094_v18 }
 0x678   :  { %1816 = vtanh.f32 %v520_v61  ;;  %v1538_v63 = vmul.f32 -1.442695, %v520_v61 }
 0x67a   :  { %1818 = vpow2.f32 %v1538_v63 }
 0x682   :  { %v1817_v62 = vpop.eup %1816 }
 0x683   :  { %532 = vrot.lane.b32.xlu1 %v1817_v62, %s1964_s19 }
 0x684   :  { %v1819_v2 = vpop.eup %1818 }
 0x685   :  { %v524_v3 = vadd.f32 1.0, %v1819_v2 }
 0x687   :  { %1820 = vrcp.f32 %v524_v3 }
 0x691   :  { %v1821_v4 = vpop.eup %1820 }
 0x692   :  { %v530_v9 = vmul.f32 %v1821_v4, %v528_v7 }
 0x6f5   :  { %v533_v5 = vpop.permute.xlu1 %532 }
 0x6f6   :  { %v535_v6 = vmul.f32 %v1821_v4, %v533_v5 }
 0x6f8   :  { %537 = vrot.lane.b32.xlu0 %v535_v6, %s1965_s3 }
 0x76a   :  { %v538_v10 = vpop.permute.xlu0 %537 }
 0x76b   :  { %v2135_v11 = vadd.f32 %v538_v10, %v530_v9 }
 0x76d   :  { %1822 = vtanh.f32 %v2135_v11  ;;  %v674_v31 = vrot.slane %v2135_v11, 6 }
 0x777   :  { %v1823_v13 = vpop.eup %1822 }
 0x778   :  { %543 = vrot.lane.b32.xlu1 %v1823_v13, %s1964_s19 }
 0x7ea   :  { %v544_v14 = vpop.permute.xlu1 %543 }
 0x7eb   :  { %v546_v15 = vmul.f32 %v1821_v4, %v544_v14 }
 0x7ed   :  { %v588_v17 = vrot.slane %v546_v15, 4 }
 0x7ef   :  { %589 = vrot.lane.b32.xlu0 %v588_v17, %s1965_s3 }
 0x861   :  { %v590_v19 = vpop.permute.xlu0 %589 }
 0x862   :  { %1655 = vmatmul.mubr.msk.f32.vlgmr.msra.gmra.mrb[4].mxu0 %vm152_vm2, %v590_v19 }
 0x863   :  { %1759 = vmatpush3.bf16.msra.mxu0 %v2053_v8  ;;  %1676 = vmatprep.mubr.msk.f32.mxu0 %vm1962_vm0, %v1963_v1 }
 0x864   :  { %1760 = vmatprep.subr.bf16.mxu0 %v1961_v0 }
 0x867   :  { %1762 = vmatpush3.bf16.msra.mxu0 %v2066_v12 }
 0x868   :  { %1769 = vmatprep.subr.bf16.mxu0 %v1961_v0 }
 0x935   :  { %v659_v20 = vpop.f32.mrb[4].mxu0 }
 0x936   :  { %v664_v21 = vrot.slane %v659_v20, 2  ;;  %v1656_v22 = vpop.f32.mrb[5].mxu0 }
 0x938   :  { %v666_v23 = vadd.f32 %v664_v21, %v2094_v18 }
 0x93a   :  { %1824 = vtanh.f32 %v666_v23  ;;  %v1540_v25 = vmul.f32 -1.442695, %v666_v23 }
 0x93c   :  { %1826 = vpow2.f32 %v1540_v25 }
 0x944   :  { %v1825_v24 = vpop.eup %1824 }
 0x945   :  { %678 = vrot.lane.b32.xlu1 %v1825_v24, %s1964_s19 }
 0x946   :  { %v1827_v26 = vpop.eup %1826 }
 0x947   :  { %v670_v27 = vadd.f32 1.0, %v1827_v26 }
 0x949   :  { %1828 = vrcp.f32 %v670_v27 }
 0x953   :  { %v1829_v28 = vpop.eup %1828 }
 0x954   :  { %v676_v32 = vmul.f32 %v1829_v28, %v674_v31 }
 0x9b7   :  { %v679_v29 = vpop.permute.xlu1 %678 }
 0x9b8   :  { %v681_v30 = vmul.f32 %v1829_v28, %v679_v29 }
 0x9ba   :  { %683 = vrot.lane.b32.xlu0 %v681_v30, %s1965_s3 }
 0xa2c   :  { %v684_v34 = vpop.permute.xlu0 %683 }
 0xa2d   :  { %v2151_v35 = vadd.f32 %v684_v34, %v676_v32 }
 0xa2f   :  { %1830 = vtanh.f32 %v2151_v35  ;;  %v819_v50 = vrot.slane %v2151_v35, 6 }
 0xa39   :  { %v1831_v18 = vpop.eup %1830 }
 0xa3a   :  { %689 = vrot.lane.b32.xlu1 %v1831_v18, %s1964_s19 }
 0xaac   :  { %v690_v36 = vpop.permute.xlu1 %689 }
 0xaad   :  { %v692_v37 = vmul.f32 %v1829_v28, %v690_v36 }
 0xaaf   :  { %v736_v38 = vrot.slane %v692_v37, 6 }
 0xab1   :  { %737 = vrot.lane.b32.xlu0 %v736_v38, %s1965_s3 }
 0xb23   :  { %v738_v39 = vpop.permute.xlu0 %737 }
 0xb24   :  { %1666 = vmatmul.mubr.msk.f32.vlgmr.msra.gmra.mrb[4].mxu1 %vm152_vm2, %v738_v39 }
 0xb25   :  { %1765 = vmatpush3.bf16.msra.mxu1 %v2053_v8  ;;  %1687 = vmatprep.mubr.msk.f32.mxu1 %vm1962_vm0, %v1963_v1 }
 0xb26   :  { %1766 = vmatprep.subr.bf16.mxu1 %v1961_v0 }
 0xb29   :  { %1768 = vmatpush3.bf16.msra.mxu1 %v2066_v12 }
 0xb2a   :  { %1775 = vmatprep.subr.bf16.mxu1 %v1961_v0 }
 0xbf7   :  { %v807_v40 = vpop.f32.mrb[4].mxu1 }
 0xbf8   :  { %v811_v41 = vadd.f32 %v807_v40, %v2092_v16  ;;  %v1667_v42 = vpop.f32.mrb[5].mxu1 }
 0xbfa   :  { %1832 = vtanh.f32 %v811_v41  ;;  %v1542_v44 = vmul.f32 -1.442695, %v811_v41  ;;  %v1966_v41 = vmov 1966171168  }
 0xbfb   :  { %v257_v42 = vunpack.c.l.s4 %v1966_v41 }
 0xbfc   :  { %1834 = vpow2.f32 %v1542_v44 }
 0xc04   :  { %v1833_v43 = vpop.eup %1832 }
 0xc05   :  { %823 = vrot.lane.b32.xlu1 %v1833_v43, %s1964_s19  ;;  %v259_v43 = vlaneseq }
 0xc06   :  { %v1835_v45 = vpop.eup %1834 }
 0xc07   :  { %v815_v46 = vadd.f32 1.0, %v1835_v45 }
 0xc09   :  { %1836 = vrcp.f32 %v815_v46 }
 0xc13   :  { %v1837_v47 = vpop.eup %1836 }
 0xc14   :  { %v821_v51 = vmul.f32 %v1837_v47, %v819_v50 }
 0xc77   :  { %v824_v48 = vpop.permute.xlu1 %823 }
 0xc78   :  { %v826_v49 = vmul.f32 %v1837_v47, %v824_v48  ;;  %v260_v48 = vshrl.u32 %v259_v43, 7 }
 0xc7a   :  { %828 = vrot.lane.b32.xlu0 %v826_v49, %s1965_s3 }
 0xcec   :  { %v829_v53 = vpop.permute.xlu0 %828 }
 0xced   :  { %v2167_v54 = vadd.f32 %v829_v53, %v821_v51 }
 0xcef   :  { %1838 = vtanh.f32 %v2167_v54 }
 0xcf9   :  { %v1839_v55 = vpop.eup %1838 }
 0xcfa   :  { %834 = vrot.lane.b32.xlu1 %v1839_v55, %s1964_s19  ;;  %v548_v55 = vcombine.high %v2135_v11, %v2135_v11 }
 0xd6c   :  { %v835_v56 = vpop.permute.xlu1 %834 }
 0xd6d   :  { %v837_v57 = vmul.f32 %v1837_v47, %v835_v56  ;;  %v258_v47 = vunpack.c.0.s8 %v257_v42  ;;  %v694_v56 = vcombine.high %v2151_v35, %v2151_v35 }
 0xd6f   :  { %878 = vrot.lane.b32.xlu0 %v837_v57, %s1965_s3  ;;  %v2204_v50 = vsub.s32 %v258_v47, %v260_v48 }
 0xd71   :  { %v262_v51 = vrot.slane %v2103_v33, %v2204_v50  ;;  %v407_v53 = vrot.slane %v2119_v52, %v2204_v50  ;;  %v555_v33 = vrot.slane %v548_v55, %v2204_v50 }
 0xd73   :  { %v270_v57 = vrot.slane %v262_v51, %v2204_v50  ;;  %v563_v35 = vrot.slane %v555_v33, %v2204_v50 }
 0xde1   :  { %v879_v58 = vpop.permute.xlu0 %878 }
 0xde2   :  { %1677 = vmatmul.mubr.msk.f32.vlgmr.msra.gmra.mrb[6].mxu0 %vm152_vm2, %v879_v58 }
 0xde3   :  { %1771 = vmatpush3.bf16.msra.mxu0 %v2053_v8  ;;  %1698 = vmatprep.mubr.msk.f32.mxu0 %vm1962_vm0, %v1963_v1 }
 0xde4   :  { %1772 = vmatprep.subr.bf16.mxu0 %v1961_v0 }
 0xde7   :  { %1774 = vmatpush3.bf16.msra.mxu0 %v2066_v12  ;;  %v963_v12 = vrot.slane %v2167_v54, 6 }
 0xde8   :  { %1781 = vmatprep.subr.bf16.mxu0 %v1961_v0 }
 0xeb5   :  { %v948_v59 = vpop.f32.mrb[6].mxu0 }
 0xeb6   :  { %v953_v60 = vrot.slane %v948_v59, 6  ;;  %v1678_v61 = vpop.f32.mrb[7].mxu0  ;;  %v701_v59 = vrot.slane %v694_v56, %v2204_v50 }
 0xeb8   :  { %v955_v62 = vadd.f32 %v953_v60, %v2092_v16  ;;  %v709_v61 = vrot.slane %v701_v59, %v2204_v50 }
 0xeba   :  { %1840 = vtanh.f32 %v955_v62  ;;  %v1544_v2 = vmul.f32 -1.442695, %v955_v62  ;;  %v845_v62 = vrot.slane %v2167_v54, %v2204_v50 }
 0xebc   :  { %1842 = vpow2.f32 %v1544_v2 }
 0xec4   :  { %v1841_v63 = vpop.eup %1840 }
 0xec5   :  { %967 = vrot.lane.b32.xlu1 %v1841_v63, %s1964_s19 }
 0xec6   :  { %v1843_v8 = vpop.eup %1842 }
 0xec7   :  { %v959_v3 = vadd.f32 1.0, %v1843_v8  ;;  %v717_v8 = vcombine.high %v709_v61, %v709_v61 }
 0xec9   :  { %1844 = vrcp.f32 %v959_v3 }
 0xed3   :  { %v1845_v4 = vpop.eup %1844 }
 0xed4   :  { %v965_v7 = vmul.f32 %v1845_v4, %v963_v12 }
 0xf37   :  { %v968_v5 = vpop.permute.xlu1 %967 }
 0xf38   :  { %v970_v6 = vmul.f32 %v1845_v4, %v968_v5  ;;  %v853_v5 = vrot.slane %v845_v62, %v2204_v50 }
 0xf3a   :  { %972 = vrot.lane.b32.xlu0 %v970_v6, %s1965_s3 }
 0xfac   :  { %v973_v9 = vpop.permute.xlu0 %972 }
 0xfad   :  { %v2183_v10 = vadd.f32 %v973_v9, %v965_v7 }
 0xfaf   :  { %1846 = vtanh.f32 %v2183_v10  ;;  %v1110_v31 = vrot.slane %v2183_v10, 6  ;;  %v989_v63 = vrot.slane %v2183_v10, %v2204_v50 }
 0xfb1   :  { %v997_v6 = vrot.slane %v989_v63, %v2204_v50 }
 0xfb3   :  { %v1005_v7 = vcombine.high %v997_v6, %v997_v6 }
 0xfb9   :  { %v1847_v13 = vpop.eup %1846 }
 0xfba   :  { %978 = vrot.lane.b32.xlu1 %v1847_v13, %s1964_s19 }
0x102c   :  { %v979_v14 = vpop.permute.xlu1 %978 }
0x102d   :  { %v981_v15 = vmul.f32 %v1845_v4, %v979_v14 }
0x102f   :  { %v1024_v17 = vrot.slane %v981_v15, 2 }
0x1031   :  { %1025 = vrot.lane.b32.xlu0 %v1024_v17, %s1965_s3 }
0x10a3   :  { %v1026_v19 = vpop.permute.xlu0 %1025 }
0x10a4   :  { %1688 = vmatmul.mubr.msk.f32.vlgmr.msra.gmra.mrb[6].mxu1 %vm152_vm2, %v1026_v19  ;;  %v263_v19 = vcombine.high %v262_v51, %v262_v51 }
0x10a5   :  { %1709 = vmatprep.mubr.msk.f32.mxu1 %vm1962_vm0, %v1963_v1 }
0x1177   :  { %v1095_v20 = vpop.f32.mrb[6].mxu1 }
0x1178   :  { %v1100_v21 = vrot.slane %v1095_v20, 4  ;;  %v1689_v22 = vpop.f32.mrb[7].mxu1  ;;  %v408_v20 = vcombine.high %v407_v53, %v407_v53 }
0x117a   :  { %v1102_v23 = vadd.f32 %v1100_v21, %v2092_v16 }
0x117c   :  { %1848 = vtanh.f32 %v1102_v23  ;;  %v1546_v25 = vmul.f32 -1.442695, %v1102_v23 }
0x117e   :  { %1850 = vpow2.f32 %v1546_v25  ;;  %v422_v25 = vrot.slane %v408_v20, %v2204_v50 }
0x1186   :  { %v1849_v24 = vpop.eup %1848 }
0x1187   :  { %1114 = vrot.lane.b32.xlu1 %v1849_v24, %s1964_s19  ;;  %v277_v24 = vrot.slane %v263_v19, %v2204_v50 }
0x1188   :  { %v1851_v26 = vpop.eup %1850 }
0x1189   :  { %v1106_v27 = vadd.f32 1.0, %v1851_v26 }
0x118b   :  { %1852 = vrcp.f32 %v1106_v27 }
0x1195   :  { %v1853_v28 = vpop.eup %1852 }
0x1196   :  { %v1112_v32 = vmul.f32 %v1853_v28, %v1110_v31 }
0x11f9   :  { %v1115_v29 = vpop.permute.xlu1 %1114 }
0x11fa   :  { %v1117_v30 = vmul.f32 %v1853_v28, %v1115_v29  ;;  %v556_v29 = vcombine.high %v555_v33, %v555_v33  ;;  %v53_v33 = vld [vmem:[%s2363_s4 + $0x8] sm:$0xff] }
0x11fc   :  { %1119 = vrot.lane.b32.xlu0 %v1117_v30, %s1965_s3  ;;  %v702_v30 = vcombine.high %v701_v59, %v701_v59 }
0x126e   :  { %v1120_v34 = vpop.permute.xlu0 %1119 }
0x126f   :  { %v2195_v18 = vadd.f32 %v1120_v34, %v1112_v32  ;;  %v570_v34 = vrot.slane %v556_v29, %v2204_v50 }
0x1271   :  { %1854 = vtanh.f32 %v2195_v18  ;;  %v1130_v3 = vcombine.high %v2195_v18, %v2195_v18 }
0x1273   :  { %v1137_v54 = vrot.slane %v1130_v3, %v2204_v50 }
0x1275   :  { %v1145_v10 = vrot.slane %v1137_v54, %v2204_v50 }
0x127b   :  { %v1855_v36 = vpop.eup %1854 }
0x127c   :  { %1125 = vrot.lane.b32.xlu1 %v1855_v36, %s1964_s19  ;;  %v716_v36 = vrot.slane %v702_v30, %v2204_v50 }
0x127e   :  { %v718_v41 = vcombine.high %v716_v36, %v716_v36 }
0x12ee   :  { %v1126_v37 = vpop.permute.xlu1 %1125 }
0x12ef   :  { %v1128_v38 = vmul.f32 %v1853_v28, %v1126_v37  ;;  %v424_v28 = vcombine.high %v422_v25, %v422_v25 }
0x12f1   :  { %v1170_v39 = vrot.slane %v1128_v38, 4  ;;  %v846_v38 = vcombine.high %v845_v62, %v845_v62 }
0x12f3   :  { %1171 = vrot.lane.b32.xlu0 %v1170_v39, %s1965_s3  ;;  %v990_v39 = vcombine.high %v989_v63, %v989_v63 }
0x1365   :  { %v1172_v40 = vpop.permute.xlu0 %1171 }
0x1366   :  { %1699 = vmatmul.mubr.msk.f32.vlgmr.msra.gmra.mrb[8].mxu0 %vm152_vm2, %v1172_v40 }
0x1367   :  { %1720 = vmatprep.mubr.msk.f32.mxu0 %vm1962_vm0, %v1963_v1  ;;  %v2210_v1 = vsub.s32 0, %v260_v48 }
0x1369   :  { %v281_v52 = vrot.slane %v270_v57, %v2210_v1  ;;  %v574_v2 = vrot.slane %v563_v35, %v2210_v1  ;;  %v722_v4 = vrot.slane %v717_v8, %v2210_v1  ;;  %v864_v12 = vrot.slane %v853_v5, %v2210_v1  ;;  %v55_v35 = vld [vmem:[%s2363_s4 + $0x18] sm:$0xff] }
0x136a   :  { %v1010_v9 = vrot.slane %v1005_v7, %v2210_v1  ;;  %v1156_v13 = vrot.slane %v1145_v10, %v2210_v1  ;;  %v285_v27 = vrot.slane %v277_v24, %v2210_v1  ;;  %v432_v32 = vrot.slane %v424_v28, %v2210_v1 }
0x136b   :  { %v578_v40 = vrot.slane %v570_v34, %v2210_v1  ;;  %v726_v43 = vrot.slane %v718_v41, %v2210_v1 }
0x1439   :  { %v1241_v44 = vpop.f32.mrb[8].mxu0 }
0x143a   :  { %v1246_v45 = vrot.slane %v1241_v44, 2  ;;  %v1700_v46 = vpop.f32.mrb[9].mxu0  ;;  %v860_v44 = vrot.slane %v846_v38, %v2204_v50 }
0x143c   :  { %v1248_v49 = vadd.f32 %v1246_v45, %v2092_v16  ;;  %v415_v16 = vrot.slane %v407_v53, %v2204_v50  ;;  %v1004_v45 = vrot.slane %v990_v39, %v2204_v50  ;;  %v868_v47 = vrot.slane %v860_v44, %v2210_v1 }
0x143e   :  { %1856 = vtanh.f32 %v1248_v49  ;;  %v423_v60 = vcombine.high %v415_v16, %v415_v16  ;;  %v1548_v14 = vmul.f32 -1.442695, %v1248_v49  ;;  %v1006_v48 = vcombine.high %v1004_v45, %v1004_v45 }
0x143f   :  { %v1138_v49 = vcombine.high %v1137_v54, %v1137_v54  ;;  %v1256_v16 = vrot.slane %v2195_v18, 6  ;;  %v54_v18 = vld [vmem:[%s2363_s4 + $0x10] sm:$0xff] }
0x1440   :  { %v428_v11 = vrot.slane %v423_v60, %v2210_v1  ;;  %1858 = vpow2.f32 %v1548_v14  ;;  %v1014_v53 = vrot.slane %v1006_v48, %v2210_v1  ;;  %v1779_v62 = vpack.c.bf16 %v55_v35, %v54_v18 }
0x1441   :  { %v1152_v55 = vrot.slane %v1138_v49, %v2204_v50 }
0x1443   :  { %v1160_v57 = vrot.slane %v1152_v55, %v2210_v1 }
0x1448   :  { %v1857_v58 = vpop.eup %1856 }
0x1449   :  { %1260 = vrot.lane.b32.xlu1 %v1857_v58, %s1964_s19  ;;  %v52_v58 = vld [vmem:[%s2363_s4] sm:$0xff]  ;;  %s1968_s4 = smov [#allocation7]  }
0x144a   :  { %v1859_v15 = vpop.eup %1858  ;;  %s1504_s11 = sshll.u32 %s1968_s4, 4  ;;  %s1505_s11 = int_to_ptr.vmem [resolvable:$true] %s1504_s11 }
0x144b   :  { %v1252_v17 = vadd.f32 1.0, %v1859_v15  ;;  %s1886_s14 = scalar_lea.vmem %s1505_s11, 32  ;;  %p1891_p9 = scmp.lt.s32.totalorder %s1505_s11, %s1505_s11 }
0x144c   :  { %p1887_p8 = scmp.ne.s32.totalorder %s1505_s11, %s1886_s14  ;;  %p1892_p10 = scmp.lt.s32.totalorder %s1886_s14, %s1886_s14 }
0x144d   :  { %286 = vrot.lane.b32.xlu1 %v281_v52, %s1967_s7  ;;  %1860 = vrcp.f32 %v1252_v17  ;;  %v1776_v52 = vpack.c.bf16 %v53_v33, %v52_v58 }
0x144e   :  { %p1893_p11 = por %p1892_p10, %p1891_p9 }
0x144f   :  { %1777 = vmatpush3.bf16.msra.mxu1 %v1776_v52  ;;  %1783 = vmatpush3.bf16.msra.mxu0 %v1776_v52 }
0x1450   :  { %1778 = vmatprep.subr.bf16.mxu1 %v1961_v0  ;;  %1784 = vmatprep.subr.bf16.mxu0 %v1961_v0  ;;  %p1894_p12 = pnand %p1893_p11, %p1887_p8 }
0x1451   :  { %433 = vrot.lane.b32.xlu1 %v428_v11, %s1967_s7 }
0x1453   :  { %1780 = vmatpush3.bf16.msra.mxu1 %v1779_v62  ;;  %1786 = vmatpush3.bf16.msra.mxu0 %v1779_v62 }
0x1455   :  { %579 = vrot.lane.b32.xlu1 %v574_v2, %s1967_s7 }
0x1457   :  { %v2247_v21 = vpop.eup %1860 }
0x1458   :  { %v1258_v59 = vmul.f32 %v2247_v21, %v1256_v16 }
0x1459   :  { %727 = vrot.lane.b32.xlu1 %v722_v4, %s1967_s7 }
0x145d   :  { %869 = vrot.lane.b32.xlu1 %v864_v12, %s1967_s7 }
0x1461   :  { %1015 = vrot.lane.b32.xlu1 %v1010_v9, %s1967_s7 }
0x1465   :  { %1161 = vrot.lane.b32.xlu1 %v1156_v13, %s1967_s7 }
0x14bb   :  { %v1261_v22 = vpop.permute.xlu1 %1260 }
0x14bc   :  { %v1263_v23 = vmul.f32 %v2247_v21, %v1261_v22 }
0x14be   :  { %1265 = vrot.lane.b32.xlu0 %v1263_v23, %s1965_s3 }
0x14bf   :  { %v287_v26 = vpop.permute.xlu1 %286 }
0x14c0   :  { %293 = vst.msk [vmem:[#allocation2] sm:$0x1] %vm292_vm3, %v287_v26 }
0x14c2   :  { %288 = vrot.lane.b32.xlu0 %v285_v27, %s1967_s7 }
0x14c3   :  { %v434_v31 = vpop.permute.xlu1 %433 }
0x14c4   :  { %439 = vst.msk [vmem:[#allocation2 + $0x1] sm:$0x1] %vm292_vm3, %v434_v31 }
0x14c6   :  { %435 = vrot.lane.b32.xlu0 %v432_v32, %s1967_s7 }
0x14c7   :  { %v580_v37 = vpop.permute.xlu1 %579 }
0x14c8   :  { %585 = vst.msk [vmem:[#allocation2 + $0x2] sm:$0x1] %vm292_vm3, %v580_v37 }
0x14ca   :  { %581 = vrot.lane.b32.xlu0 %v578_v40, %s1967_s7 }
0x14cb   :  { %v728_v42 = vpop.permute.xlu1 %727 }
0x14cc   :  { %733 = vst.msk [vmem:[#allocation2 + $0x3] sm:$0x1] %vm292_vm3, %v728_v42 }
0x14ce   :  { %729 = vrot.lane.b32.xlu0 %v726_v43, %s1967_s7 }
0x14cf   :  { %v870_v46 = vpop.permute.xlu1 %869 }
0x14d0   :  { %875 = vst.msk [vmem:[#allocation2 + $0x4] sm:$0x1] %vm292_vm3, %v870_v46 }
0x14d2   :  { %871 = vrot.lane.b32.xlu0 %v868_v47, %s1967_s7 }
0x14d3   :  { %v1016_v51 = vpop.permute.xlu1 %1015 }
0x14d4   :  { %1021 = vst.msk [vmem:[#allocation2 + $0x5] sm:$0x1] %vm292_vm3, %v1016_v51 }
0x14d6   :  { %1017 = vrot.lane.b32.xlu0 %v1014_v53, %s1967_s7 }
0x14d7   :  { %v1162_v56 = vpop.permute.xlu1 %1161 }
0x14d8   :  { %1167 = vst.msk [vmem:[#allocation2 + $0x6] sm:$0x1] %vm292_vm3, %v1162_v56 }
0x14da   :  { %1163 = vrot.lane.b32.xlu0 %v1160_v57, %s1967_s7 }
0x1530   :  { %v1266_v60 = vpop.permute.xlu0 %1265 }
0x1531   :  { %v1268_v11 = vadd.f32 %v1266_v60, %v1258_v59 }
0x1533   :  { %v1276_v61 = vcombine.high %v1268_v11, %v1268_v11  ;;  %1862 = vtanh.f32 %v1268_v11 }
0x1534   :  { %v289_v63 = vpop.permute.xlu0 %288 }
0x1535   :  { %v1283_v2 = vrot.slane %v1276_v61, %v2204_v50  ;;  %294 = vst.msk [vmem:[#allocation2 + $0x8] sm:$0x1] %vm292_vm3, %v289_v63 }
0x1537   :  { %v1291_v8 = vrot.slane %v1283_v2, %v2204_v50  ;;  %v1284_v3 = vcombine.high %v1283_v2, %v1283_v2 }
0x1538   :  { %v436_v4 = vpop.permute.xlu0 %435 }
0x1539   :  { %440 = vst.msk [vmem:[#allocation2 + $0x9] sm:$0x1] %vm292_vm3, %v436_v4  ;;  %v1299_v5 = vcombine.high %v1291_v8, %v1291_v8  ;;  %v1298_v6 = vrot.slane %v1284_v3, %v2204_v50 }
0x153b   :  { %v1304_v0 = vrot.slane %v1299_v5, %v2210_v1  ;;  %v1300_v54 = vcombine.high %v1298_v6, %v1298_v6 }
0x153c   :  { %v582_v12 = vpop.permute.xlu0 %581 }
0x153d   :  { %586 = vst.msk [vmem:[#allocation2 + $0xa] sm:$0x1] %vm292_vm3, %v582_v12  ;;  %1309 = vrot.lane.b32.xlu1 %v1304_v0, %s1967_s7  ;;  %v1308_v7 = vrot.slane %v1300_v54, %v2210_v1  ;;  %v1863_v9 = vpop.eup %1862 }
0x153f   :  { %1311 = vrot.lane.b32.xlu0 %v1308_v7, %s1967_s7 }
0x1540   :  { %v730_v10 = vpop.permute.xlu0 %729 }
0x1541   :  { %734 = vst.msk [vmem:[#allocation2 + $0xb] sm:$0x1] %vm292_vm3, %v730_v10  ;;  %1271 = vrot.lane.b32.xlu1 %v1863_v9, %s1964_s19 }
0x1544   :  { %v872_v13 = vpop.permute.xlu0 %871 }
0x1545   :  { %876 = vst.msk [vmem:[#allocation2 + $0xc] sm:$0x1] %vm292_vm3, %v872_v13  ;;  %1482 = vrot.lane.b32.xlu1 %v1268_v11, %s1967_s7 }
0x1548   :  { %v1018_v50 = vpop.permute.xlu0 %1017 }
0x1549   :  { %1022 = vst.msk [vmem:[#allocation2 + $0xd] sm:$0x1] %vm292_vm3, %v1018_v50 }
0x154c   :  { %v1164_v14 = vpop.permute.xlu0 %1163 }
0x154d   :  { %1168 = vst.msk [vmem:[#allocation2 + $0xe] sm:$0x1] %vm292_vm3, %v1164_v14 }
0x15af   :  { %v1310_v1 = vpop.permute.xlu1 %1309 }
0x15b0   :  { %1315 = vst.msk [vmem:[#allocation2 + $0x7] sm:$0x1] %vm292_vm3, %v1310_v1 }
0x15b1   :  { %v1312_v15 = vpop.permute.xlu0 %1311 }
0x15b2   :  { %1316 = vst.msk [vmem:[#allocation2 + $0xf] sm:$0x1] %vm292_vm3, %v1312_v15 }
0x15b3   :  { %v1272_v17 = vpop.permute.xlu1 %1271 }
0x15b4   :  { %v1274_v19 = vmul.f32 %v2247_v21, %v1272_v17 }
0x15b6   :  { %1477 = vrot.lane.b32.xlu0 %v1274_v19, %s1965_s3 }
0x15b7   :  { %v1483_v20 = vpop.permute.xlu1 %1482  ;;  %v1317_v22 = vld [vmem:[#allocation2] sm:$0xff] }
0x15b8   :  { %1485 = vst.msk [vmem:[#allocation9 - $0x6] sm:$0xc0] %vm1480_vm4, %v1483_v20  ;;  %1710 = vmatmul.mubr.msk.f32.vlgmr.msra.gmra.mrb[8].mxu1 %vm152_vm2, %v1317_v22 }
0x15b9   :  { %v1400_v23 = vld [vmem:[#allocation2 + $0x8] sm:$0xff] }
0x15ba   :  { %1721 = vmatmul.mubr.msk.f32.vlgmr.msra.gmra.mrb[10].mxu0 %vm152_vm2, %v1400_v23 }
0x1628   :  { %v1478_v24 = vpop.permute.xlu0 %1477 }
0x1629   :  { %1481 = vst.msk [vmem:[#allocation7 - $0x6] sm:$0xc0] %vm1480_vm4, %v1478_v24 }
0x162a   :  { %1897 = shalt.err (!%p1894_p12)
}
0x162b   :  { %s1898_s17 = scalar_lea.hbm %s2368_s9, 32 }
0x162c   :  { %p1899_p13 = scmp.ne.s32.totalorder %s2368_s9, %s1898_s17  ;;  %p1902_p0 = scmp.lt.u32.totalorder %s1898_s17, %s2368_s9 }
0x162e   :  { %p1904_p1 = pnand %p1902_p0, %p1899_p13 }
0x1630   :  { %1907 = shalt.err (!%p1904_p1)
}
0x1631   :  { %1507 = dma.vmem_to_hbm [thread:$0]  %s1505_s11, 32, %s2368_s9, [#allocation8]  }
0x1632   :  { %s1908_s21 = scalar_lea.vmem %s1515_s13, 32  ;;  %p1913_p3 = scmp.lt.s32.totalorder %s1515_s13, %s1515_s13 }
0x1633   :  { %p1909_p2 = scmp.ne.s32.totalorder %s1515_s13, %s1908_s21  ;;  %p1914_p4 = scmp.lt.s32.totalorder %s1908_s21, %s1908_s21 }
0x1635   :  { %p1915_p5 = por %p1914_p4, %p1913_p3 }
0x1637   :  { %p1916_p6 = pnand %p1915_p5, %p1909_p2 }
0x1639   :  { %1919 = shalt.err (!%p1916_p6)
}
0x163a   :  { %s1920_s22 = scalar_lea.hbm %s2369_s10, 32 }
0x163b   :  { %p1921_p7 = scmp.ne.s32.totalorder %s2369_s10, %s1920_s22  ;;  %p1924_p8 = scmp.lt.u32.totalorder %s1920_s22, %s2369_s10 }
0x163d   :  { %p1926_p9 = pnand %p1924_p8, %p1921_p7 }
0x163f   :  { %1929 = shalt.err (!%p1926_p9)
}
0x1640   :  { %1517 = dma.vmem_to_hbm [thread:$0]  %s1515_s13, 32, %s2369_s10, [#allocation8]   ;;  %v1549_v21 = vld [vmem:[%s2364_s5] ss:$0 sm:$0xff]  ;;  %vm1397_vm5 = vcmask 80896  }
0x1641   :  { %s1970_s4 = smov [#allocation6]  }
0x1642   :  { %s1491_s11 = sshll.u32 %s1970_s4, 4  ;;  %s1492_s11 = int_to_ptr.vmem [resolvable:$true] %s1491_s11 }
0x1643   :  { %s1930_s12 = scalar_lea.vmem %s1492_s11, 256  ;;  %p1935_p11 = scmp.lt.s32.totalorder %s1492_s11, %s1492_s11 }
0x1644   :  { %p1931_p10 = scmp.ne.s32.totalorder %s1492_s11, %s1930_s12  ;;  %p1936_p12 = scmp.lt.s32.totalorder %s1930_s12, %s1930_s12 }
0x1646   :  { %p1937_p13 = por %p1936_p12, %p1935_p11 }
0x1648   :  { %p1938_p0 = pnand %p1937_p13, %p1931_p10 }
0x168b   :  { %v1393_v25 = vpop.f32.mrb[8].mxu1 }
0x168c   :  { %v1394_v26 = vadd.f32 %v1549_v21, %v1393_v25  ;;  %v1711_v27 = vpop.f32.mrb[9].mxu1 }
0x168d   :  { %v1470_v28 = vpop.f32.mrb[10].mxu0 }
0x168e   :  { %v1471_v29 = vadd.f32 %v1549_v21, %v1470_v28  ;;  %v1722_v30 = vpop.f32.mrb[11].mxu0  ;;  %1398 = vst.msk [vmem:[#allocation6] sm:$0xff] %vm1397_vm5, %v1394_v26 }
0x1690   :  { %1475 = vst.msk [vmem:[#allocation6 + $0x8] sm:$0xff] %vm1397_vm5, %v1471_v29 }
0x1691   :  { %1941 = shalt.err (!%p1938_p0)
}
0x1692   :  { %s1942_s13 = scalar_lea.hbm %s2367_s8, 256 }
0x1693   :  { %p1943_p1 = scmp.ne.s32.totalorder %s2367_s8, %s1942_s13  ;;  %p1946_p2 = scmp.lt.u32.totalorder %s1942_s13, %s2367_s8 }
0x1695   :  { %p1948_p3 = pnand %p1946_p2, %p1943_p1 }
0x1697   :  { %1951 = shalt.err (!%p1948_p3)
}
0x1698   :  { %1497 = dma.vmem_to_hbm [thread:$0]  %s1492_s11, 256, %s2367_s8, [#allocation5], %s1959_s23, %s1959_s23, %s1960_s24  }
0x1699   :  { %1954 = dma.done.wait [#allocation5], 256  }
0x169a   :  { %1955 = vsyncadd [#allocation5], 4294967040 }
0x169b   :  { %1956 = dma.done.wait [#allocation8], 64  }
0x169c   :  { %1957 = vsyncadd [#allocation8], 4294967232 }
0x169d   :  { %1527 = vsyncpa [#allocation4], 1 }
0x169e   :  { %1528 = vsyncpa [#allocation5], 1 }
0x169f   :  { %1529 = vsyncpa [#allocation8], 1 }

</bundles_post_ra>
